<compile_context>
chip_gen: v7x
topology: tpu7x:2x2x1
jax: 0.10.0
libtpu: 0.0.40
codegen_flags: <defaults>
</compile_context>

<pallas_src>
import functools
import math

import jax
import jax.numpy as jnp
from jax.experimental import pallas as pl
from jax.experimental.pallas import tpu as pltpu

_HIDDEN = 128   # shared trunk width
_HEAD = 64      # per-head hidden width
_PACK = 128     # lane-dense packed width (logits/probs | value | zero padding)


def _actor_critic_kernel(x_ref, w1_ref, b1_ref, wh1_ref, bh1_ref,
                         wh2_ref, bh2_ref, probs_ref, value_ref, *, action_dim):
    # shared trunk: [tb,S]bf16 @ [S,128]bf16 -> f32 accumulate
    h = jnp.dot(x_ref[...], w1_ref[...], preferred_element_type=jnp.float32)
    h = jnp.maximum(h + b1_ref[...], 0.0)

    # fused head layer 1: cols 0..63 -> actor hidden, cols 64..127 -> critic hidden
    hc = jnp.dot(h.astype(jnp.bfloat16), wh1_ref[...],
                 preferred_element_type=jnp.float32)
    hc = jnp.maximum(hc + bh1_ref[...], 0.0)

    # fused head layer 2 (block-diagonal): cols 0..A-1 logits, col A value, rest 0
    out2 = jnp.dot(hc.astype(jnp.bfloat16), wh2_ref[...],
                   preferred_element_type=jnp.float32) + bh2_ref[...]

    col = jax.lax.broadcasted_iota(jnp.int32, out2.shape, 1)
    is_logit = col < action_dim

    # numerically-stable softmax over the logit lanes only; exact divide on the
    # [tb,1] denominator so probabilities are safe for categorical sampling.
    masked = jnp.where(is_logit, out2, -jnp.inf)
    m = jnp.max(masked, axis=-1, keepdims=True)
    e = jnp.exp(masked - m)                              # non-logit lanes -> 0
    denom = jnp.sum(e, axis=-1, keepdims=True)
    probs_ref[...] = (e * (1.0 / denom)).astype(probs_ref.dtype)

    # critic value: lane A of the fused head-2 output, stored exact f32
    value_ref[...] = jnp.sum(jnp.where(col == action_dim, out2, 0.0),
                             axis=-1, keepdims=True)


def _round_up(n, m):
    return ((n + m - 1) // m) * m


def _choose_batch_tiling(B, batch_tile, min_tiles):
    """Split B rows into n tiles of tb rows (tb multiple of 8, padding < 8/tile)."""
    n = pl.cdiv(B, batch_tile)
    if min_tiles > 1 and B >= 8 * min_tiles:
        # >= min_tiles (and a multiple of it) so "parallel" can feed both v7x TCs
        n = _round_up(max(n, min_tiles), min_tiles)
    tb = _round_up(pl.cdiv(B, n), 8)
    return pl.cdiv(B, tb), tb


def actor_critic_forward(x, fused, action_dim, *, batch_tile=2048, min_tiles=2):
    """x: [B, state_dim] f32.  fused: dict from fuse_params().  Returns (probs, value)."""
    B, S = x.shape
    A = action_dim
    assert A + 1 <= _PACK, "packed head needs action_dim + 1 <= 128"

    n_tiles, tb = _choose_batch_tiling(B, batch_tile, min_tiles)

    # bf16 activations: halves x DMA bytes and uses the native bf16 MXU path.
    x16 = x.astype(jnp.bfloat16)

    # weights/biases stay resident in VMEM across grid steps (block index fixed).
    weight_specs = [
        pl.BlockSpec((S, _HIDDEN), lambda i: (0, 0)),        # w1  (bf16)
        pl.BlockSpec((1, _HIDDEN), lambda i: (0, 0)),        # b1  (f32)
        pl.BlockSpec((_HIDDEN, _HIDDEN), lambda i: (0, 0)),  # wh1 (bf16, wa1|wc1)
        pl.BlockSpec((1, _HIDDEN), lambda i: (0, 0)),        # bh1 (f32)
        pl.BlockSpec((_HIDDEN, _PACK), lambda i: (0, 0)),    # wh2 (bf16, block-diag)
        pl.BlockSpec((1, _PACK), lambda i: (0, 0)),          # bh2 (f32)
    ]

    flops = 2 * B * (S * _HIDDEN + _HIDDEN * _HIDDEN + _HIDDEN * _PACK)
    bytes_accessed = (
        2 * B * S + 2 * B * _PACK + 4 * B                               # x, probs, value
        + 2 * (S * _HIDDEN + _HIDDEN * _HIDDEN + _HIDDEN * _PACK)       # bf16 weights
        + 4 * (2 * _HIDDEN + _PACK))                                    # f32 biases
    cost = pl.CostEstimate(flops=flops, transcendentals=B * A,
                           bytes_accessed=bytes_accessed)

    # Raise scoped VMEM only if a very large batch_tile needs it (v5e default 16 MiB).
    tile_io_bytes = 2 * (tb * S * 2 + tb * _PACK * 2 + tb * 4)          # double-buffered
    weight_bytes = (2 * (S * _HIDDEN + _HIDDEN * _HIDDEN + _HIDDEN * _PACK)
                    + 4 * (2 * _HIDDEN + _PACK))
    vmem_estimate = tile_io_bytes + 2 * weight_bytes + (1 << 20)
    compiler_kwargs = dict(dimension_semantics=("parallel",))
    if vmem_estimate > 12 * (1 << 20):
        compiler_kwargs["vmem_limit_bytes"] = int(min(64 * (1 << 20),
                                                      2 * vmem_estimate))

    probs_packed, value = pl.pallas_call(
        functools.partial(_actor_critic_kernel, action_dim=A),
        out_shape=(jax.ShapeDtypeStruct((B, _PACK), jnp.bfloat16),
                   jax.ShapeDtypeStruct((B, 1), jnp.float32)),
        grid=(n_tiles,),
        in_specs=[pl.BlockSpec((tb, S), lambda i: (i, 0))] + weight_specs,
        out_specs=(pl.BlockSpec((tb, _PACK), lambda i: (i, 0)),
                   pl.BlockSpec((tb, 1), lambda i: (i, 0))),
        compiler_params=pltpu.CompilerParams(**compiler_kwargs),
        cost_estimate=cost,
    )(x16, fused["w1"], fused["b1"], fused["wh1"], fused["bh1"],
      fused["wh2"], fused["bh2"])

    probs = probs_packed[:, :A].astype(jnp.float32)   # fuses into consumer under jit
    return probs, value


def _torch_linear_init(key, fan_in, fan_out):
    """PyTorch nn.Linear default init: U(-1/sqrt(fan_in), 1/sqrt(fan_in))."""
    kw, kb = jax.random.split(key)
    bound = 1.0 / math.sqrt(fan_in)
    # stored as [in, out] (transposed vs torch's [out, in]) so y = x @ W + b
    w = jax.random.uniform(kw, (fan_in, fan_out), jnp.float32, -bound, bound)
    b = jax.random.uniform(kb, (1, fan_out), jnp.float32, -bound, bound)
    return w, b


def make_params(key, state_dim, action_dim):
    keys = jax.random.split(key, 5)
    w1, b1 = _torch_linear_init(keys[0], state_dim, _HIDDEN)
    wa1, ba1 = _torch_linear_init(keys[1], _HIDDEN, _HEAD)
    wa2, ba2 = _torch_linear_init(keys[2], _HEAD, action_dim)
    wc1, bc1 = _torch_linear_init(keys[3], _HIDDEN, _HEAD)
    wc2, bc2 = _torch_linear_init(keys[4], _HEAD, 1)
    return dict(w1=w1, b1=b1, wa1=wa1, ba1=ba1, wa2=wa2, ba2=ba2,
                wc1=wc1, bc1=bc1, wc2=wc2, bc2=bc2)


def fuse_params(p, action_dim):
    """One-time fusion of actor/critic head weights (done outside the kernel)."""
    A = action_dim
    # head layer 1: actor cols 0..63, critic cols 64..127
    wh1 = jnp.concatenate([p["wa1"], p["wc1"]], axis=1)           # [128, 128]
    bh1 = jnp.concatenate([p["ba1"], p["bc1"]], axis=1)           # [1, 128]
    # head layer 2: block diagonal, padded to 128 lanes; zero blocks are exact zeros
    wh2 = jnp.zeros((_HIDDEN, _PACK), jnp.float32)
    wh2 = wh2.at[:_HEAD, :A].set(p["wa2"])                        # actor block
    wh2 = wh2.at[_HEAD:, A:A + 1].set(p["wc2"])                   # critic block
    bh2 = jnp.zeros((1, _PACK), jnp.float32)
    bh2 = bh2.at[:, :A].set(p["ba2"])
    bh2 = bh2.at[:, A:A + 1].set(p["bc2"])
    # bf16 weights for the MXU; biases stay f32 (added after the f32-accum matmul)
    return dict(w1=p["w1"].astype(jnp.bfloat16), b1=p["b1"],
                wh1=wh1.astype(jnp.bfloat16), bh1=bh1,
                wh2=wh2.astype(jnp.bfloat16), bh2=bh2)


def _reference_forward(x, p):
    h = jnp.maximum(x @ p["w1"] + p["b1"], 0.0)
    a = jnp.maximum(h @ p["wa1"] + p["ba1"], 0.0)
    logits = a @ p["wa2"] + p["ba2"]
    probs = jax.nn.softmax(logits, axis=-1)
    c = jnp.maximum(h @ p["wc1"] + p["bc1"], 0.0)
    value = c @ p["wc2"] + p["bc2"]
    return probs, value


if __name__ == "__main__":
    STATE_DIM, ACTION_DIM = 16, 8

    key = jax.random.PRNGKey(0)
    k_x1, k_x2, k_p = jax.random.split(key, 3)
    params = make_params(k_p, STATE_DIM, ACTION_DIM)
    fused = fuse_params(params, ACTION_DIM)

    fwd = jax.jit(actor_critic_forward,
                  static_argnames=("action_dim", "batch_tile", "min_tiles"))

    # B=8: single full tile.  B=37: two tiles + partial last block (masked write).
    for bk, B in ((k_x1, 8), (k_x2, 37)):
        x = jax.random.normal(bk, (B, STATE_DIM), jnp.float32)
        probs, value = fwd(x, fused, action_dim=ACTION_DIM)
        probs = jax.block_until_ready(probs)
        value = jax.block_until_ready(value)

        ref_probs, ref_value = _reference_forward(x, params)

        assert probs.shape == (B, ACTION_DIM)
        assert value.shape == (B, 1)
        # bf16 MXU inputs / bf16 probs store -> a few 1e-3 abs error vs f32 reference
        assert jnp.allclose(jnp.sum(probs, axis=-1), 1.0, atol=5e-3)
        assert jnp.allclose(probs, ref_probs, atol=5e-3)
        assert jnp.allclose(value, ref_value, atol=1e-2)

    print("KERNEL_OK")
</pallas_src>

<mosaic_0001>
module attributes {stable_mosaic.version = 11 : i64} {
  func.func @_actor_critic_kernel(%arg0: i32, %arg1: memref<8x16xbf16, #tpu.memory_space<vmem>>, %arg2: memref<16x128xbf16, #tpu.memory_space<vmem>>, %arg3: memref<1x128xf32, #tpu.memory_space<vmem>>, %arg4: memref<128x128xbf16, #tpu.memory_space<vmem>>, %arg5: memref<1x128xf32, #tpu.memory_space<vmem>>, %arg6: memref<128x128xbf16, #tpu.memory_space<vmem>>, %arg7: memref<1x128xf32, #tpu.memory_space<vmem>>, %arg8: memref<8x128xbf16, #tpu.memory_space<vmem>>, %arg9: memref<8x1xf32, #tpu.memory_space<vmem>>) attributes {dimension_semantics = [#tpu.dimension_semantics<parallel>], iteration_bounds = array<i64: 1>, scalar_prefetch = 0 : i64, scratch_operands = 0 : i64, tpu.core_type = #tpu.core_type<tc>, window_params = [{transform_indices = @transform_0, window_bounds = array<i64: 8, 16>}, {pipeline_mode = #tpu.pipeline_mode<synchronous>, transform_indices = @transform_1, window_bounds = array<i64: 16, 128>}, {pipeline_mode = #tpu.pipeline_mode<synchronous>, transform_indices = @transform_2, window_bounds = array<i64: 1, 128>}, {pipeline_mode = #tpu.pipeline_mode<synchronous>, transform_indices = @transform_3, window_bounds = array<i64: 128, 128>}, {pipeline_mode = #tpu.pipeline_mode<synchronous>, transform_indices = @transform_4, window_bounds = array<i64: 1, 128>}, {pipeline_mode = #tpu.pipeline_mode<synchronous>, transform_indices = @transform_5, window_bounds = array<i64: 128, 128>}, {pipeline_mode = #tpu.pipeline_mode<synchronous>, transform_indices = @transform_6, window_bounds = array<i64: 1, 128>}, {transform_indices = @transform_7, window_bounds = array<i64: 8, 128>}, {transform_indices = @transform_8, window_bounds = array<i64: 8, 1>}]} {
    %c0 = arith.constant 0 : index
    %c0_0 = arith.constant 0 : index
    %0 = vector.load %arg1[%c0, %c0_0] : memref<8x16xbf16, #tpu.memory_space<vmem>>, vector<8x16xbf16>
    %c0_1 = arith.constant 0 : index
    %c0_2 = arith.constant 0 : index
    %1 = vector.load %arg2[%c0_1, %c0_2] : memref<16x128xbf16, #tpu.memory_space<vmem>>, vector<16x128xbf16>
    %cst = arith.constant dense<0.000000e+00> : vector<8x128xf32>
    %2 = tpu.matmul %0, %1, %cst {dimension_numbers = #tpu.dot_dimension_numbers<[1], [0], [0], [1], [0, 0, 1, 1], [], []>} : vector<8x16xbf16>, vector<16x128xbf16>, vector<8x128xf32> -> vector<8x128xf32>
    %c0_3 = arith.constant 0 : index
    %c0_4 = arith.constant 0 : index
    %3 = vector.load %arg3[%c0_3, %c0_4] : memref<1x128xf32, #tpu.memory_space<vmem>>, vector<1x128xf32>
    %4 = vector.broadcast %3 : vector<1x128xf32> to vector<8x128xf32>
    %5 = arith.addf %2, %4 : vector<8x128xf32>
    %cst_5 = arith.constant 0.000000e+00 : f32
    %6 = vector.broadcast %cst_5 : f32 to vector<8x128xf32>
    %7 = arith.maximumf %5, %6 : vector<8x128xf32>
    %8 = arith.truncf %7 : vector<8x128xf32> to vector<8x128xbf16>
    %c0_6 = arith.constant 0 : index
    %c0_7 = arith.constant 0 : index
    %9 = vector.load %arg4[%c0_6, %c0_7] : memref<128x128xbf16, #tpu.memory_space<vmem>>, vector<128x128xbf16>
    %cst_8 = arith.constant dense<0.000000e+00> : vector<8x128xf32>
    %10 = tpu.matmul %8, %9, %cst_8 {dimension_numbers = #tpu.dot_dimension_numbers<[1], [0], [0], [1], [0, 0, 1, 1], [], []>} : vector<8x128xbf16>, vector<128x128xbf16>, vector<8x128xf32> -> vector<8x128xf32>
    %c0_9 = arith.constant 0 : index
    %c0_10 = arith.constant 0 : index
    %11 = vector.load %arg5[%c0_9, %c0_10] : memref<1x128xf32, #tpu.memory_space<vmem>>, vector<1x128xf32>
    %12 = vector.broadcast %11 : vector<1x128xf32> to vector<8x128xf32>
    %13 = arith.addf %10, %12 : vector<8x128xf32>
    %cst_11 = arith.constant 0.000000e+00 : f32
    %14 = vector.broadcast %cst_11 : f32 to vector<8x128xf32>
    %15 = arith.maximumf %13, %14 : vector<8x128xf32>
    %16 = arith.truncf %15 : vector<8x128xf32> to vector<8x128xbf16>
    %c0_12 = arith.constant 0 : index
    %c0_13 = arith.constant 0 : index
    %17 = vector.load %arg6[%c0_12, %c0_13] : memref<128x128xbf16, #tpu.memory_space<vmem>>, vector<128x128xbf16>
    %cst_14 = arith.constant dense<0.000000e+00> : vector<8x128xf32>
    %18 = tpu.matmul %16, %17, %cst_14 {dimension_numbers = #tpu.dot_dimension_numbers<[1], [0], [0], [1], [0, 0, 1, 1], [], []>} : vector<8x128xbf16>, vector<128x128xbf16>, vector<8x128xf32> -> vector<8x128xf32>
    %c0_15 = arith.constant 0 : index
    %c0_16 = arith.constant 0 : index
    %19 = vector.load %arg7[%c0_15, %c0_16] : memref<1x128xf32, #tpu.memory_space<vmem>>, vector<1x128xf32>
    %20 = vector.broadcast %19 : vector<1x128xf32> to vector<8x128xf32>
    %21 = arith.addf %18, %20 : vector<8x128xf32>
    %22 = tpu.iota {dimensions = array<i32: 1>} : vector<8x128xi32>
    %c8_i32 = arith.constant 8 : i32
    %23 = vector.broadcast %c8_i32 : i32 to vector<8x128xi32>
    %24 = arith.cmpi slt, %22, %23 : vector<8x128xi32>
    %cst_17 = arith.constant 0xFF800000 : f32
    %25 = vector.broadcast %cst_17 : f32 to vector<8x128xf32>
    %26 = arith.select %24, %21, %25 : vector<8x128xi1>, vector<8x128xf32>
    %cst_18 = arith.constant dense<0xFF800000> : vector<8xf32>
    %27 = vector.multi_reduction <maximumf>, %26, %cst_18 [1] : vector<8x128xf32> to vector<8xf32>
    %28 = vector.shape_cast %27 : vector<8xf32> to vector<8x1xf32>
    %29 = vector.broadcast %28 : vector<8x1xf32> to vector<8x128xf32>
    %30 = arith.subf %26, %29 : vector<8x128xf32>
    %31 = math.exp %30 : vector<8x128xf32>
    %cst_19 = arith.constant dense<0.000000e+00> : vector<8xf32>
    %32 = vector.multi_reduction <add>, %31, %cst_19 [1] : vector<8x128xf32> to vector<8xf32>
    %33 = vector.shape_cast %32 : vector<8xf32> to vector<8x1xf32>
    %cst_20 = arith.constant 1.000000e+00 : f32
    %34 = vector.broadcast %cst_20 : f32 to vector<8x1xf32>
    %35 = arith.divf %34, %33 : vector<8x1xf32>
    %36 = vector.broadcast %35 : vector<8x1xf32> to vector<8x128xf32>
    %37 = arith.mulf %31, %36 : vector<8x128xf32>
    %38 = arith.truncf %37 : vector<8x128xf32> to vector<8x128xbf16>
    %c0_21 = arith.constant 0 : index
    %c0_22 = arith.constant 0 : index
    %39 = vector.load %arg8[%c0_21, %c0_22] : memref<8x128xbf16, #tpu.memory_space<vmem>>, vector<8x128xbf16>
    tpu.vector_store %arg8[%c0_21, %c0_22], %38 {strides = array<i32>} : memref<8x128xbf16, #tpu.memory_space<vmem>>, vector<8x128xbf16>,
    %c8_i32_23 = arith.constant 8 : i32
    %40 = vector.broadcast %c8_i32_23 : i32 to vector<8x128xi32>
    %41 = arith.cmpi eq, %22, %40 : vector<8x128xi32>
    %cst_24 = arith.constant 0.000000e+00 : f32
    %42 = vector.broadcast %cst_24 : f32 to vector<8x128xf32>
    %43 = arith.select %41, %21, %42 : vector<8x128xi1>, vector<8x128xf32>
    %cst_25 = arith.constant dense<0.000000e+00> : vector<8xf32>
    %44 = vector.multi_reduction <add>, %43, %cst_25 [1] : vector<8x128xf32> to vector<8xf32>
    %45 = vector.shape_cast %44 : vector<8xf32> to vector<8x1xf32>
    %c0_26 = arith.constant 0 : index
    %c0_27 = arith.constant 0 : index
    %46 = vector.load %arg9[%c0_26, %c0_27] : memref<8x1xf32, #tpu.memory_space<vmem>>, vector<8x1xf32>
    tpu.vector_store %arg9[%c0_26, %c0_27], %45 {strides = array<i32>} : memref<8x1xf32, #tpu.memory_space<vmem>>, vector<8x1xf32>,
    return
  }
  func.func @transform_0(%arg0: i32) -> (i32, i32) {
    %c0_i32 = arith.constant 0 : i32
    %c0_i32_0 = arith.constant 0 : i32
    return %arg0, %c0_i32 : i32, i32
  }
  func.func @transform_1(%arg0: i32) -> (i32, i32) {
    %c0_i32 = arith.constant 0 : i32
    %c0_i32_0 = arith.constant 0 : i32
    %c0_i32_1 = arith.constant 0 : i32
    return %c0_i32, %c0_i32_0 : i32, i32
  }
  func.func @transform_2(%arg0: i32) -> (i32, i32) {
    %c0_i32 = arith.constant 0 : i32
    %c0_i32_0 = arith.constant 0 : i32
    %c0_i32_1 = arith.constant 0 : i32
    return %c0_i32, %c0_i32_0 : i32, i32
  }
  func.func @transform_3(%arg0: i32) -> (i32, i32) {
    %c0_i32 = arith.constant 0 : i32
    %c0_i32_0 = arith.constant 0 : i32
    %c0_i32_1 = arith.constant 0 : i32
    return %c0_i32, %c0_i32_0 : i32, i32
  }
  func.func @transform_4(%arg0: i32) -> (i32, i32) {
    %c0_i32 = arith.constant 0 : i32
    %c0_i32_0 = arith.constant 0 : i32
    %c0_i32_1 = arith.constant 0 : i32
    return %c0_i32, %c0_i32_0 : i32, i32
  }
  func.func @transform_5(%arg0: i32) -> (i32, i32) {
    %c0_i32 = arith.constant 0 : i32
    %c0_i32_0 = arith.constant 0 : i32
    %c0_i32_1 = arith.constant 0 : i32
    return %c0_i32, %c0_i32_0 : i32, i32
  }
  func.func @transform_6(%arg0: i32) -> (i32, i32) {
    %c0_i32 = arith.constant 0 : i32
    %c0_i32_0 = arith.constant 0 : i32
    %c0_i32_1 = arith.constant 0 : i32
    return %c0_i32, %c0_i32_0 : i32, i32
  }
  func.func @transform_7(%arg0: i32) -> (i32, i32) {
    %c0_i32 = arith.constant 0 : i32
    %c0_i32_0 = arith.constant 0 : i32
    return %arg0, %c0_i32 : i32, i32
  }
  func.func @transform_8(%arg0: i32) -> (i32, i32) {
    %c0_i32 = arith.constant 0 : i32
    %c0_i32_0 = arith.constant 0 : i32
    return %arg0, %c0_i32 : i32, i32
  }
}

</mosaic_0001>

<bundles_post_ra>
// kernel: actor_critic_forward.1
= control target key start
LH: loop header
LB: loop body
LE: loop exit
PB: predicated region body
PF: predicated region fallthrough
CT: control target
= control target key end

     0   :  { %14 = vsyncpa [#allocation3], 0  ;;  %s653_s0 = inlined_call_operand.vmem [shape: bf16[8,16], index: 0, kind: input, shape index: {}]   ;;  %s654_s1 = inlined_call_operand.vmem [shape: bf16[16,128], index: 1, kind: input, shape index: {}]   ;;  %s655_s2 = inlined_call_operand.vmem [shape: f32[1,128], index: 2, kind: input, shape index: {}]   ;;  %s656_s3 = inlined_call_operand.hbm [shape: bf16[128,128], index: 3, kind: input, shape index: {}]   ;;  %s657_s4 = inlined_call_operand.vmem [shape: f32[1,128], index: 4, kind: input, shape index: {}]   ;;  %s658_s5 = inlined_call_operand.hbm [shape: bf16[128,128], index: 5, kind: input, shape index: {}]   ;;  %s659_s6 = inlined_call_operand.vmem [shape: f32[1,128], index: 6, kind: input, shape index: {}]   ;;  %s660_s7 = inlined_call_operand.vmem [shape: bf16[8,128], index: 7, kind: output, shape index: {0}]   ;;  %s661_s8 = inlined_call_operand.vmem [shape: f32[8,1], index: 8, kind: output, shape index: {1}]  }
   0x1   :  { %15 = vsyncpa [#allocation5], 0  ;;  %s537_s27 = smov [#allocation2]   ;;  %s489_s9 = scalar_lea.hbm %s656_s3, 1024 }
   0x2   :  { %s27_s28 = sshll.u32 %s537_s27, 4  ;;  %p490_p0 = scmp.ne.s32.totalorder %s656_s3, %s489_s9  ;;  %s28_s28 = int_to_ptr.vmem [resolvable:$true] %s27_s28 }
   0x3   :  { %p493_p1 = scmp.lt.u32.totalorder %s489_s9, %s656_s3 }
   0x5   :  { %p495_p2 = pnand %p493_p1, %p490_p0 }
   0x7   :  { %498 = shalt.err (!%p495_p2)
}
   0x8   :  { %s499_s14 = scalar_lea.vmem %s28_s28, 1024  ;;  %p504_p4 = scmp.lt.s32.totalorder %s28_s28, %s28_s28 }
   0x9   :  { %p500_p3 = scmp.ne.s32.totalorder %s28_s28, %s499_s14  ;;  %p505_p5 = scmp.lt.s32.totalorder %s499_s14, %s499_s14 }
   0xb   :  { %p506_p6 = por %p505_p5, %p504_p4 }
   0xd   :  { %p507_p7 = pnand %p506_p6, %p500_p3 }
   0xf   :  { %510 = shalt.err (!%p507_p7)
}
  0x10   :  { %s538_s15 = smov 64   ;;  %s539_s16 = smov 4  }
  0x11   :  { %33 = dma.hbm_to_vmem [thread:$0]  %s656_s3, 1024, %s28_s28, [#allocation3], %s538_s15, %s538_s15, %s539_s16  }
  0x12   :  { %s540_s19 = smov [#allocation4]   ;;  %s511_s23 = scalar_lea.hbm %s658_s5, 1024 }
  0x13   :  { %s41_s20 = sshll.u32 %s540_s19, 4  ;;  %p512_p8 = scmp.ne.s32.totalorder %s658_s5, %s511_s23  ;;  %s42_s20 = int_to_ptr.vmem [resolvable:$true] %s41_s20 }
  0x14   :  { %p515_p9 = scmp.lt.u32.totalorder %s511_s23, %s658_s5 }
  0x16   :  { %p517_p10 = pnand %p515_p9, %p512_p8 }
  0x18   :  { %520 = shalt.err (!%p517_p10)
}
  0x19   :  { %s521_s29 = scalar_lea.vmem %s42_s20, 1024  ;;  %p526_p12 = scmp.lt.s32.totalorder %s42_s20, %s42_s20 }
  0x1a   :  { %p522_p11 = scmp.ne.s32.totalorder %s42_s20, %s521_s29  ;;  %p527_p13 = scmp.lt.s32.totalorder %s521_s29, %s521_s29 }
  0x1c   :  { %p528_p0 = por %p527_p13, %p526_p12 }
  0x1e   :  { %p529_p1 = pnand %p528_p0, %p522_p11 }
  0x20   :  { %532 = shalt.err (!%p529_p1)
}
  0x21   :  { %47 = dma.hbm_to_vmem [thread:$0]  %s658_s5, 1024, %s42_s20, [#allocation5], %s538_s15, %s538_s15, %s539_s16  }
  0x22   :  { %533 = dma.done.wait [#allocation3], 1024  }
  0x23   :  { %534 = vsyncadd [#allocation3], 4294966272 }
  0x24   :  { %535 = dma.done.wait [#allocation5], 1024  }
  0x25   :  { %536 = vsyncadd [#allocation5], 4294966272  ;;  %v541_v0 = vmov 0.0   ;;  %vm542_vm0 = vmmov 0   ;;  %v468_v1 = vld [vmem:[%s654_s1] sm:$0xff]   ;;  %vm73_vm1 = vcmask 130048   ;;  %v343_v35 = vlaneseq }
  0x26   :  { %416 = vmatprep.subr.bf16.mxu0 %v541_v0  ;;  %418 = vmatprep.mubr.msk.bf16.mxu0 %vm542_vm0, %v541_v0  ;;  %v57_v2 = vld [vmem:[%s653_s0] sm:$0xf]  ;;  %v470_v4 = vld [vmem:[#allocation2 + $0x8] sm:$0xff]   ;;  %v471_v5 = vld [vmem:[#allocation2 + $0x10] sm:$0xff]   ;;  %vm363_vm4 = vcmask 7168  }
  0x27   :  { %422 = vmatprep.subr.bf16.mxu1 %v541_v0  ;;  %438 = vmatprep.mubr.msk.bf16.mxu1 %vm542_vm0, %v541_v0  ;;  %v469_v3 = vld [vmem:[#allocation2] sm:$0xff]   ;;  %v472_v6 = vld [vmem:[#allocation2 + $0x18] sm:$0xff]   ;;  %v474_v8 = vld [vmem:[#allocation2 + $0x28] sm:$0xff]   ;;  %v344_v36 = vand.u32 127, %v343_v35 }
  0x28   :  { %417 = vmatpush3.bf16.msra.mxu0 %v468_v1  ;;  %423 = vmatpush3.bf16.msra.mxu1 %v469_v3  ;;  %v473_v7 = vld [vmem:[#allocation2 + $0x20] sm:$0xff]   ;;  %v475_v9 = vld [vmem:[#allocation2 + $0x30] sm:$0xff]   ;;  %v476_v10 = vld [vmem:[#allocation2 + $0x38] sm:$0xff]  }
  0x29   :  { %442 = vmatprep.subr.bf16.mxu0 %v541_v0  ;;  %424 = vmatprep.subr.bf16.mxu1 %v541_v0  ;;  %v477_v11 = vld [vmem:[#allocation4] sm:$0xff]   ;;  %v478_v12 = vld [vmem:[#allocation4 + $0x8] sm:$0xff]   ;;  %v479_v13 = vld [vmem:[#allocation4 + $0x10] sm:$0xff]   ;;  %vm359_vm2 = vcmp.eq.s32.totalorder %v344_v36, 8  ;;  %vm345_vm3 = vcmp.lt.s32.totalorder %v344_v36, 8 }
  0x2a   :  { %v480_v14 = vld [vmem:[#allocation4 + $0x18] sm:$0xff]   ;;  %v481_v15 = vld [vmem:[#allocation4 + $0x20] sm:$0xff]   ;;  %v482_v16 = vld [vmem:[#allocation4 + $0x28] sm:$0xff]  }
  0x2b   :  { %419 = vmatmul.mubr.msk.bf16.vlgmr.msra.gmra.mrb[0].mxu0 %vm73_vm1, %v57_v2  ;;  %v375_v17 = vld [vmem:[%s655_s2] ss:$0 sm:$0xff]  ;;  %v483_v25 = vld [vmem:[#allocation4 + $0x30] sm:$0xff]   ;;  %v484_v26 = vld [vmem:[#allocation4 + $0x38] sm:$0xff]  }
  0x2c   :  { %458 = vmatprep.mubr.msk.bf16.mxu0 %vm542_vm0, %v541_v0  ;;  %425 = vmatpush3.bf16.msra.mxu1 %v470_v4  ;;  %v378_v27 = vld [vmem:[%s657_s4] ss:$0 sm:$0xff] }
  0x2d   :  { %426 = vmatprep.subr.bf16.mxu1 %v541_v0  ;;  %443 = vmatpush3.bf16.msra.mxu0 %v477_v11  ;;  %v387_v37 = vld [vmem:[%s659_s6] ss:$0 sm:$0xff] }
  0x2e   :  { %444 = vmatprep.subr.bf16.mxu0 %v541_v0 }
  0x30   :  { %427 = vmatpush3.bf16.msra.mxu1 %v471_v5 }
  0x31   :  { %428 = vmatprep.subr.bf16.mxu1 %v541_v0  ;;  %445 = vmatpush3.bf16.msra.mxu0 %v478_v12 }
  0x32   :  { %446 = vmatprep.subr.bf16.mxu0 %v541_v0 }
  0x34   :  { %429 = vmatpush3.bf16.msra.mxu1 %v472_v6 }
  0x35   :  { %430 = vmatprep.subr.bf16.mxu1 %v541_v0  ;;  %447 = vmatpush3.bf16.msra.mxu0 %v479_v13 }
  0x36   :  { %448 = vmatprep.subr.bf16.mxu0 %v541_v0 }
  0x38   :  { %431 = vmatpush3.bf16.msra.mxu1 %v473_v7 }
  0x39   :  { %432 = vmatprep.subr.bf16.mxu1 %v541_v0  ;;  %449 = vmatpush3.bf16.msra.mxu0 %v480_v14 }
  0x3a   :  { %450 = vmatprep.subr.bf16.mxu0 %v541_v0 }
  0x3c   :  { %433 = vmatpush3.bf16.msra.mxu1 %v474_v8 }
  0x3d   :  { %434 = vmatprep.subr.bf16.mxu1 %v541_v0  ;;  %451 = vmatpush3.bf16.msra.mxu0 %v481_v15 }
  0x3e   :  { %452 = vmatprep.subr.bf16.mxu0 %v541_v0 }
  0x40   :  { %435 = vmatpush3.bf16.msra.mxu1 %v475_v9 }
  0x41   :  { %436 = vmatprep.subr.bf16.mxu1 %v541_v0  ;;  %453 = vmatpush3.bf16.msra.mxu0 %v482_v16 }
  0x42   :  { %454 = vmatprep.subr.bf16.mxu0 %v541_v0 }
  0x44   :  { %437 = vmatpush3.bf16.msra.mxu1 %v476_v10 }
  0x45   :  { %455 = vmatpush3.bf16.msra.mxu0 %v483_v25 }
  0x46   :  { %456 = vmatprep.subr.bf16.mxu0 %v541_v0 }
  0x49   :  { %457 = vmatpush3.bf16.msra.mxu0 %v484_v26 }
  0xfe   :  { %v111_v18 = vpop.f32.mrb[0].mxu0 }
  0xff   :  { %v112_v19 = vadd.f32 %v375_v17, %v111_v18  ;;  %v420_v20 = vpop.f32.mrb[1].mxu0 }
 0x100   :  { %v114_v21 = vpop.f32.mrb[2].mxu0 }
 0x101   :  { %v117_v22 = vmax.f32 %v112_v19, 0.0  ;;  %v421_v23 = vpop.f32.mrb[3].mxu0 }
 0x103   :  { %v118_v24 = vpack.c.bf16 %v117_v22, %v117_v22 }
 0x105   :  { %439 = vmatmul.mubr.bf16.vlgmr.msra.gmra.mrb[0].mxu1 %v118_v24 }
 0x1d8   :  { %v224_v28 = vpop.f32.mrb[0].mxu1 }
 0x1d9   :  { %v225_v29 = vadd.f32 %v378_v27, %v224_v28  ;;  %v440_v30 = vpop.f32.mrb[1].mxu1 }
 0x1da   :  { %v227_v31 = vpop.f32.mrb[2].mxu1 }
 0x1db   :  { %v230_v32 = vmax.f32 %v225_v29, 0.0  ;;  %v441_v33 = vpop.f32.mrb[3].mxu1 }
 0x1dd   :  { %v231_v34 = vpack.c.bf16 %v230_v32, %v230_v32 }
 0x1df   :  { %459 = vmatmul.mubr.bf16.vlgmr.msra.gmra.mrb[4].mxu0 %v231_v34 }
 0x2b2   :  { %v337_v38 = vpop.f32.mrb[4].mxu0 }
 0x2b3   :  { %v338_v39 = vadd.f32 %v387_v37, %v337_v38  ;;  %v460_v40 = vpop.f32.mrb[5].mxu0 }
 0x2b4   :  { %v340_v41 = vpop.f32.mrb[6].mxu0 }
 0x2b5   :  { %v461_v42 = vpop.f32.mrb[7].mxu0  ;;  %v360_v43 = vsel %vm359_vm2, %v338_v39, 0.0  ;;  %v346_v44 = vsel %vm345_vm3, %v338_v39, -inf }
 0x2b6   :  { %361 = vadd.xlane.f32.xlu1 %v360_v43  ;;  %347 = vmax.xlane.f32.xlu0 %v346_v44 }
 0x343   :  { %v362_v45 = vpop.xlane.xlu1 %361  ;;  %v348_v46 = vpop.xlane.xlu0 %347 }
 0x344   :  { %364 = vst.msk [vmem:[%s661_s8] sm:$0xff] %vm363_vm4, %v362_v45  ;;  %v349_v47 = vsub.f32 %v346_v44, %v348_v46 }
 0x346   :  { %v350_v48 = vmul.f32 1.442695, %v349_v47 }
 0x348   :  { %485 = vpow2.f32 %v350_v48 }
 0x352   :  { %v486_v49 = vpop.eup %485 }
 0x353   :  { %352 = vadd.xlane.f32.xlu0 %v486_v49 }
 0x3e0   :  { %v353_v50 = vpop.xlane.xlu0 %352 }
 0x3e1   :  { %487 = vrcp.f32 %v353_v50 }
 0x3eb   :  { %v488_v51 = vpop.eup %487 }
 0x3ec   :  { %v356_v52 = vmul.f32 %v488_v51, %v486_v49 }
 0x3ee   :  { %v357_v53 = vpack.c.bf16 %v356_v52, %v356_v52 }
 0x3f0   :  { %358 = vst [vmem:[%s660_s7] sm:$0xf] %v357_v53 }
 0x3f1   :  { %373 = vsyncpa [#allocation3], 1 }
 0x3f2   :  { %374 = vsyncpa [#allocation5], 1 }

</bundles_post_ra>
